<compile_context>
chip_gen: v7x
topology: tpu7x:2x2x1
jax: 0.10.0
libtpu: 0.0.40
codegen_flags: <defaults>
</compile_context>

<pallas_src>
import functools

import jax
import jax.numpy as jnp
from jax.experimental import pallas as pl
from jax.experimental.pallas import tpu as pltpu


def _round_up(x: int, m: int) -> int:
    return (x + m - 1) // m * m


def _ce_label_smooth_kernel(logits_ref, targets_ref, out_ref, *,
                            epsilon: float, num_classes: int, n_total: int,
                            tile_batch: int, class_axis: int):
    i = pl.program_id(0)
    batch_axis = 1 - class_axis

    x = logits_ref[...].astype(jnp.float32)     # (TB, C) or (C, TB)
    t = targets_ref[...]                        # (TB, 1) or (1, TB) int32

    # Numerically stable log-softmax pieces over the class axis. Only per-row
    # scalars (max / lse / picked / row-sum) are kept live.
    m = jnp.max(x, axis=class_axis, keepdims=True)
    shifted = x - m
    lse = jnp.log(jnp.sum(jnp.exp(shifted), axis=class_axis, keepdims=True))

    # Gather shifted[n, t_n] via iota compare (replaces the scatter_/one-hot).
    class_ids = jax.lax.broadcasted_iota(jnp.int32, x.shape, class_axis)
    picked = jnp.sum(jnp.where(class_ids == t, shifted, 0.0),
                     axis=class_axis, keepdims=True)

    gathered_logp = picked - lse                                   # logp[n, t_n]
    sum_logp = (jnp.sum(shifted, axis=class_axis, keepdims=True)
                - float(num_classes) * lse)                        # sum_c logp[n, c]

    per_row = ((1.0 - epsilon) * gathered_logp
               + (epsilon / float(num_classes)) * sum_logp)

    # Mask batch rows that only exist because of padding up to the tile size.
    batch_ids = (jax.lax.broadcasted_iota(jnp.int32, per_row.shape, batch_axis)
                 + i * tile_batch)
    per_row = jnp.where(batch_ids < n_total, per_row, 0.0)

    tile_sum = jnp.sum(per_row, keepdims=True)                     # (1, 1)

    # Per-tile partial sum written into this tile's private, lane-dense
    # (8, 128) output block (value at [0, 0], zeros elsewhere).  No carried
    # accumulator -> the batch grid axis can be "parallel" (megacore on v7x).
    flat = (jax.lax.broadcasted_iota(jnp.int32, out_ref.shape, 0)
            * out_ref.shape[1]
            + jax.lax.broadcasted_iota(jnp.int32, out_ref.shape, 1))
    out_ref[...] = jnp.where(flat == 0, tile_sum, 0.0).astype(out_ref.dtype)


def cross_entropy_label_smooth(logits, targets, *, num_classes, epsilon,
                               max_tile_batch=None):
    """logits: (N, num_classes) float (f32/bf16); targets: (N,) int class ids."""
    n, c = logits.shape
    assert c == num_classes, (c, num_classes)
    targets = targets.astype(jnp.int32)
    itemsize = jnp.dtype(logits.dtype).itemsize

    # Keep a double-buffered logits block comfortably inside scoped VMEM
    # (v7x has only 64 MiB physical / 32 MiB scoped per TensorCore).
    budget_bytes = 2 * 1024 * 1024

    # Layout dispatch: small class counts go lane-dense (batch on lanes).
    transposed = c < 128
    if transposed:
        if max_tile_batch is None:
            tb_cap = max(128, (budget_bytes // (c * itemsize)) // 128 * 128)
        else:
            tb_cap = max(1, int(max_tile_batch))
        if n <= tb_cap:
            tile_batch, n_pad = n, n
        else:
            tile_batch = _round_up(min(tb_cap, n), 128)   # lane dim: x128
            n_pad = _round_up(n, tile_batch)
    else:
        tb_cap = 512 if max_tile_batch is None else int(max_tile_batch)
        tb = max(8, min(tb_cap, (budget_bytes // (c * itemsize)) // 8 * 8))
        if n <= tb:
            tile_batch, n_pad = n, n
        else:
            tile_batch = max(8, tb // 8 * 8)              # sublane dim: x8
            n_pad = _round_up(n, tile_batch)
        # TODO(synk): for very large C (block row > ~4 MiB) add class-axis
        # tiling with a streaming (online) logsumexp instead of whole rows.

    if n_pad != n:
        logits = jnp.pad(logits, ((0, n_pad - n), (0, 0)))
        targets = jnp.pad(targets, ((0, n_pad - n),))

    if transposed:
        # TODO(synk): the wrapper-side transpose costs one extra HBM pass; a
        # fused lane-packing load for tiny C would avoid it.
        logits_in = logits.T                              # (C, N_pad)
        targets_in = targets.reshape(1, n_pad)
        in_specs = [
            pl.BlockSpec((c, tile_batch), lambda i: (0, i)),
            pl.BlockSpec((1, tile_batch), lambda i: (0, i)),
        ]
        class_axis = 0
    else:
        logits_in = logits                                # (N_pad, C)
        targets_in = targets.reshape(n_pad, 1)
        in_specs = [
            pl.BlockSpec((tile_batch, c), lambda i: (i, 0)),
            pl.BlockSpec((tile_batch, 1), lambda i: (i, 0)),
        ]
        class_axis = 1

    num_tiles = n_pad // tile_batch

    kernel = functools.partial(
        _ce_label_smooth_kernel,
        epsilon=float(epsilon), num_classes=int(c), n_total=int(n),
        tile_batch=int(tile_batch), class_axis=class_axis)

    cost = pl.CostEstimate(
        flops=5 * n * c,
        transcendentals=n * c + n,
        bytes_accessed=n * c * itemsize + n * 4 + num_tiles * 8 * 128 * 4,
    )

    partial = pl.pallas_call(
        kernel,
        out_shape=jax.ShapeDtypeStruct((num_tiles * 8, 128), jnp.float32),
        grid_spec=pltpu.PrefetchScalarGridSpec(
            num_scalar_prefetch=0,
            grid=(num_tiles,),
            in_specs=in_specs,
            out_specs=pl.BlockSpec((8, 128), lambda i: (i, 0)),
        ),
        compiler_params=pltpu.CompilerParams(
            dimension_semantics=("parallel",),
            vmem_limit_bytes=32 * 1024 * 1024,
        ),
        cost_estimate=cost,
    )(logits_in, targets_in)

    # Tiny final reduction over per-tile partial sums; scale by -1/N (mean
    # over the true batch, then sum over classes).
    return -(jnp.sum(partial) / float(n))


def _reference(logits, targets, *, num_classes, epsilon):
    # Pure-JAX mirror of the PyTorch forward, for sanity checking.
    log_probs = jax.nn.log_softmax(logits.astype(jnp.float32), axis=1)
    one_hot = jax.nn.one_hot(targets, num_classes, dtype=jnp.float32)
    smoothed = (1.0 - epsilon) * one_hot + epsilon / num_classes
    return jnp.sum(jnp.mean(-smoothed * log_probs, axis=0))


if __name__ == "__main__":
    NUM_CLASSES = 16
    EPSILON = 0.1
    BATCH = 8

    key = jax.random.PRNGKey(0)
    k_logits, k_targets = jax.random.split(key)
    logits = jax.random.normal(k_logits, (BATCH, NUM_CLASSES), dtype=jnp.float32)
    targets = jax.random.randint(k_targets, (BATCH,), 0, NUM_CLASSES,
                                 dtype=jnp.int32)

    loss = cross_entropy_label_smooth(logits, targets,
                                      num_classes=NUM_CLASSES, epsilon=EPSILON)
    loss = jax.block_until_ready(loss)
    ref = _reference(logits, targets, num_classes=NUM_CLASSES, epsilon=EPSILON)
    assert jnp.allclose(loss, ref, rtol=1e-4, atol=1e-4), (loss, ref)

    # Extra self-checks: exercise both layouts, multi-tile "parallel" grids
    # with batch padding, and bf16 logits.
    extra_cases = [
        (700, 16, jnp.float32, {"max_tile_batch": 256}),  # lane-dense, 3 tiles + pad
        (700, 16, jnp.float32, {}),                       # lane-dense, 1 big tile
        (100, 256, jnp.float32, {"max_tile_batch": 16}),  # (N,C) layout, 7 tiles + pad
        (37, 128, jnp.bfloat16, {}),                      # bf16 HBM traffic, 1 tile
    ]
    for (n, c, dt, kw) in extra_cases:
        kl, kt = jax.random.split(jax.random.PRNGKey(n * 1000 + c))
        lg = jax.random.normal(kl, (n, c), dtype=jnp.float32).astype(dt)
        tg = jax.random.randint(kt, (n,), 0, c, dtype=jnp.int32)
        got = jax.block_until_ready(
            cross_entropy_label_smooth(lg, tg, num_classes=c,
                                       epsilon=EPSILON, **kw))
        want = _reference(lg.astype(jnp.float32), tg,
                          num_classes=c, epsilon=EPSILON)
        assert jnp.allclose(got, want, rtol=1e-4, atol=1e-4), (n, c, dt, got, want)

    print("KERNEL_OK")
</pallas_src>

<mosaic_0001>
module attributes {stable_mosaic.version = 11 : i64} {
  func.func @_ce_label_smooth_kernel(%arg0: i32, %arg1: memref<16x8xf32, #tpu.memory_space<vmem>>, %arg2: memref<1x8xi32, #tpu.memory_space<vmem>>, %arg3: memref<8x128xf32, #tpu.memory_space<vmem>>) attributes {dimension_semantics = [#tpu.dimension_semantics<parallel>], iteration_bounds = array<i64: 1>, scalar_prefetch = 0 : i64, scratch_operands = 0 : i64, tpu.core_type = #tpu.core_type<tc>, window_params = [{transform_indices = @transform_0, window_bounds = array<i64: 16, 8>}, {transform_indices = @transform_1, window_bounds = array<i64: 1, 8>}, {transform_indices = @transform_2, window_bounds = array<i64: 8, 128>}]} {
    %c0 = arith.constant 0 : index
    %c0_0 = arith.constant 0 : index
    %0 = vector.load %arg1[%c0, %c0_0] : memref<16x8xf32, #tpu.memory_space<vmem>>, vector<16x8xf32>
    %c0_1 = arith.constant 0 : index
    %c0_2 = arith.constant 0 : index
    %1 = vector.load %arg2[%c0_1, %c0_2] : memref<1x8xi32, #tpu.memory_space<vmem>>, vector<1x8xi32>
    %cst = arith.constant dense<0xFF800000> : vector<8xf32>
    %2 = vector.multi_reduction <maximumf>, %0, %cst [0] : vector<16x8xf32> to vector<8xf32>
    %3 = vector.shape_cast %2 : vector<8xf32> to vector<1x8xf32>
    %4 = vector.broadcast %3 : vector<1x8xf32> to vector<16x8xf32>
    %5 = arith.subf %0, %4 : vector<16x8xf32>
    %6 = math.exp %5 : vector<16x8xf32>
    %cst_3 = arith.constant dense<0.000000e+00> : vector<8xf32>
    %7 = vector.multi_reduction <add>, %6, %cst_3 [0] : vector<16x8xf32> to vector<8xf32>
    %8 = vector.shape_cast %7 : vector<8xf32> to vector<1x8xf32>
    %9 = math.log %8 : vector<1x8xf32>
    %10 = tpu.iota {dimensions = array<i32: 0>} : vector<16x8xi32>
    %11 = vector.broadcast %1 : vector<1x8xi32> to vector<16x8xi32>
    %12 = arith.cmpi eq, %10, %11 : vector<16x8xi32>
    %cst_4 = arith.constant 0.000000e+00 : f32
    %13 = vector.broadcast %cst_4 : f32 to vector<16x8xf32>
    %14 = arith.select %12, %5, %13 : vector<16x8xi1>, vector<16x8xf32>
    %cst_5 = arith.constant dense<0.000000e+00> : vector<8xf32>
    %15 = vector.multi_reduction <add>, %14, %cst_5 [0] : vector<16x8xf32> to vector<8xf32>
    %16 = vector.shape_cast %15 : vector<8xf32> to vector<1x8xf32>
    %17 = arith.subf %16, %9 : vector<1x8xf32>
    %cst_6 = arith.constant dense<0.000000e+00> : vector<8xf32>
    %18 = vector.multi_reduction <add>, %5, %cst_6 [0] : vector<16x8xf32> to vector<8xf32>
    %19 = vector.shape_cast %18 : vector<8xf32> to vector<1x8xf32>
    %cst_7 = arith.constant 1.600000e+01 : f32
    %20 = vector.broadcast %cst_7 : f32 to vector<1x8xf32>
    %21 = arith.mulf %20, %9 : vector<1x8xf32>
    %22 = arith.subf %19, %21 : vector<1x8xf32>
    %cst_8 = arith.constant 0.899999976 : f32
    %23 = vector.broadcast %cst_8 : f32 to vector<1x8xf32>
    %24 = arith.mulf %23, %17 : vector<1x8xf32>
    %cst_9 = arith.constant 6.250000e-03 : f32
    %25 = vector.broadcast %cst_9 : f32 to vector<1x8xf32>
    %26 = arith.mulf %25, %22 : vector<1x8xf32>
    %27 = arith.addf %24, %26 : vector<1x8xf32>
    %28 = tpu.iota {dimensions = array<i32: 1>} : vector<1x8xi32>
    %c8_i32 = arith.constant 8 : i32
    %29 = arith.muli %arg0, %c8_i32 : i32
    %30 = vector.broadcast %29 : i32 to vector<1x8xi32>
    %31 = arith.addi %28, %30 : vector<1x8xi32>
    %c8_i32_10 = arith.constant 8 : i32
    %32 = vector.broadcast %c8_i32_10 : i32 to vector<1x8xi32>
    %33 = arith.cmpi slt, %31, %32 : vector<1x8xi32>
    %cst_11 = arith.constant 0.000000e+00 : f32
    %34 = vector.broadcast %cst_11 : f32 to vector<1x8xf32>
    %35 = arith.select %33, %27, %34 : vector<1x8xi1>, vector<1x8xf32>
    %36 = vector.shape_cast %35 : vector<1x8xf32> to vector<1x1x8xf32>
    %cst_12 = arith.constant dense<0.000000e+00> : vector<1xf32>
    %37 = vector.multi_reduction <add>, %36, %cst_12 [1, 2] : vector<1x1x8xf32> to vector<1xf32>
    %38 = vector.shape_cast %37 : vector<1xf32> to vector<1x1x1xf32>
    %39 = vector.extract %38[0, 0, 0] : f32 from vector<1x1x1xf32>
    %40 = vector.broadcast %39 : f32 to vector<1x1xf32>
    %41 = tpu.iota {dimensions = array<i32: 0>} : vector<8x128xi32>
    %c128_i32 = arith.constant 128 : i32
    %42 = vector.broadcast %c128_i32 : i32 to vector<8x128xi32>
    %43 = arith.muli %41, %42 : vector<8x128xi32>
    %44 = tpu.iota {dimensions = array<i32: 1>} : vector<8x128xi32>
    %45 = arith.addi %43, %44 : vector<8x128xi32>
    %c0_i32 = arith.constant 0 : i32
    %46 = vector.broadcast %c0_i32 : i32 to vector<8x128xi32>
    %47 = arith.cmpi eq, %45, %46 : vector<8x128xi32>
    %cst_13 = arith.constant 0.000000e+00 : f32
    %48 = vector.shape_cast %40 : vector<1x1xf32> to vector<1x1xf32>
    %49 = vector.broadcast %48 : vector<1x1xf32> to vector<8x128xf32>
    %50 = vector.broadcast %cst_13 : f32 to vector<8x128xf32>
    %51 = arith.select %47, %49, %50 : vector<8x128xi1>, vector<8x128xf32>
    %c0_14 = arith.constant 0 : index
    %c0_15 = arith.constant 0 : index
    %52 = vector.load %arg3[%c0_14, %c0_15] : memref<8x128xf32, #tpu.memory_space<vmem>>, vector<8x128xf32>
    tpu.vector_store %arg3[%c0_14, %c0_15], %51 {strides = array<i32>} : memref<8x128xf32, #tpu.memory_space<vmem>>, vector<8x128xf32>,
    return
  }
  func.func @transform_0(%arg0: i32) -> (i32, i32) {
    %c0_i32 = arith.constant 0 : i32
    %c0_i32_0 = arith.constant 0 : i32
    return %c0_i32, %arg0 : i32, i32
  }
  func.func @transform_1(%arg0: i32) -> (i32, i32) {
    %c0_i32 = arith.constant 0 : i32
    %c0_i32_0 = arith.constant 0 : i32
    return %c0_i32, %arg0 : i32, i32
  }
  func.func @transform_2(%arg0: i32) -> (i32, i32) {
    %c0_i32 = arith.constant 0 : i32
    %c0_i32_0 = arith.constant 0 : i32
    return %arg0, %c0_i32 : i32, i32
  }
}

</mosaic_0001>

<bundles_post_ra>
// kernel: tpu_custom_call.1
= control target key start
LH: loop header
LB: loop body
LE: loop exit
PB: predicated region body
PF: predicated region fallthrough
CT: control target
= control target key end

     0   :  { %vm15_vm0 = vcmask 64512   ;;  %s199_s0 = inlined_call_operand.vmem [shape: f32[16,8], index: 0, kind: input, shape index: {}]   ;;  %s200_s1 = inlined_call_operand.vmem [shape: s32[1,8], index: 1, kind: input, shape index: {}]   ;;  %s201_s2 = inlined_call_operand.hbm [shape: f32[8,128], index: 2, kind: output, shape index: {}]  }
   0x1   :  { %v12_v0 = vld [vmem:[%s199_s0] sm:$0xff]  ;;  %v13_v1 = vld [vmem:[%s199_s0 + $0x8] sm:$0xff] }
   0x2   :  { %v16_v2 = vsel %vm15_vm0, %v12_v0, -inf  ;;  %v17_v3 = vsel %vm15_vm0, %v13_v1, -inf }
   0x3   :  { %7 = vsyncpa [#allocation3], 0  ;;  %v18_v4 = vmax.f32 %v16_v2, %v17_v3  ;;  %v42_v9 = vlaneseq  ;;  %v115_v18 = vld [vmem:[%s200_s1] ss:$0 sm:$0xff]  ;;  %vm84_vm4 = vcmask 57344   ;;  %s149_s1 = smov [#allocation2]  }
   0x4   :  { %s107_s14 = sshll.u32 %s149_s1, 4  ;;  %s108_s14 = int_to_ptr.vmem [resolvable:$true] %s107_s14 }
   0x5   :  { %v19_v5 = vrot.slane %v18_v4, 4  ;;  %v173_v12 = vshrl.u32 %v42_v9, 7  ;;  %v78_v54 = vand.u32 127, %v42_v9  ;;  %s125_s16 = scalar_lea.vmem %s108_s14, 128  ;;  %p130_p1 = scmp.lt.s32.totalorder %s108_s14, %s108_s14 }
   0x6   :  { %p126_p0 = scmp.ne.s32.totalorder %s108_s14, %s125_s16  ;;  %p131_p2 = scmp.lt.s32.totalorder %s125_s16, %s125_s16 }
   0x7   :  { %v20_v6 = vmax.f32 %v18_v4, %v19_v5  ;;  %v44_v17 = vadd.s32 8, %v173_v12  ;;  %vm49_vm1 = vcmp.eq.s32.totalorder %v173_v12, %v115_v18  ;;  %vm82_vm3 = vcmp.lt.s32.totalorder %v78_v54, 8 }
   0x8   :  { %v95_v4 = vmul.u32 128, %v173_v12  ;;  %p132_p3 = por %p131_p2, %p130_p1 }
   0x9   :  { %v21_v7 = vrot.slane %v20_v6, 2  ;;  %vm50_vm2 = vcmp.eq.s32.totalorder %v44_v17, %v115_v18 }
   0xa   :  { %v96_v5 = vadd.s32 %v95_v4, %v78_v54  ;;  %p133_p4 = pnand %p132_p3, %p126_p0 }
   0xb   :  { %v22_v8 = vmax.f32 %v20_v6, %v21_v7 }
   0xc   :  { %vm97_vm5 = vcmp.eq.s32.totalorder %v96_v5, 0 }
   0xd   :  { %v23_v10 = vrot.slane %v22_v8, 1 }
   0xf   :  { %v24_v11 = vmax.f32 %v22_v8, %v23_v10 }
  0x11   :  { %v25_v13 = vsub.f32 %v12_v0, %v24_v11  ;;  %v26_v14 = vsub.f32 %v13_v1, %v24_v11 }
  0x13   :  { %v27_v15 = vmul.f32 1.442695, %v25_v13  ;;  %v29_v16 = vmul.f32 1.442695, %v26_v14  ;;  %v51_v19 = vsel %vm49_vm1, %v25_v13, 0.0  ;;  %v52_v20 = vsel %vm50_vm2, %v26_v14, 0.0 }
  0x14   :  { %v53_v21 = vsel %vm15_vm0, %v51_v19, 0.0  ;;  %v54_v22 = vsel %vm15_vm0, %v52_v20, 0.0  ;;  %v63_v26 = vsel %vm15_vm0, %v25_v13, 0.0  ;;  %v64_v27 = vsel %vm15_vm0, %v26_v14, 0.0 }
  0x15   :  { %119 = vpow2.f32 %v27_v15  ;;  %v55_v29 = vadd.f32 %v54_v22, %v53_v21  ;;  %v65_v31 = vadd.f32 %v64_v27, %v63_v26 }
  0x16   :  { %121 = vpow2.f32 %v29_v16 }
  0x17   :  { %v56_v33 = vrot.slane %v55_v29, 4  ;;  %v66_v35 = vrot.slane %v65_v31, 4 }
  0x19   :  { %v57_v37 = vadd.f32 %v56_v33, %v55_v29  ;;  %v67_v39 = vadd.f32 %v66_v35, %v65_v31 }
  0x1b   :  { %v58_v41 = vrot.slane %v57_v37, 2  ;;  %v68_v43 = vrot.slane %v67_v39, 2 }
  0x1d   :  { %v59_v44 = vadd.f32 %v58_v41, %v57_v37  ;;  %v69_v45 = vadd.f32 %v68_v43, %v67_v39 }
  0x1f   :  { %v120_v23 = vpop.eup %119  ;;  %v60_v46 = vrot.slane %v59_v44, 1  ;;  %v70_v47 = vrot.slane %v69_v45, 1 }
  0x20   :  { %v122_v24 = vpop.eup %121  ;;  %v31_v25 = vsel %vm15_vm0, %v120_v23, 0.0 }
  0x21   :  { %v32_v28 = vsel %vm15_vm0, %v122_v24, 0.0  ;;  %v61_v48 = vadd.f32 %v60_v46, %v59_v44  ;;  %v71_v51 = vadd.f32 %v70_v47, %v69_v45 }
  0x22   :  { %v33_v30 = vadd.f32 %v32_v28, %v31_v25 }
  0x24   :  { %v34_v32 = vrot.slane %v33_v30, 4 }
  0x26   :  { %v35_v34 = vadd.f32 %v34_v32, %v33_v30 }
  0x28   :  { %v36_v36 = vrot.slane %v35_v34, 2 }
  0x2a   :  { %v37_v38 = vadd.f32 %v36_v36, %v35_v34 }
  0x2c   :  { %v38_v40 = vrot.slane %v37_v38, 1 }
  0x2e   :  { %v39_v42 = vadd.f32 %v38_v40, %v37_v38 }
  0x30   :  { %123 = vlog2.f32 %v39_v42 }
  0x3a   :  { %v124_v49 = vpop.eup %123 }
  0x3b   :  { %v41_v50 = vmul.f32 0.6931472, %v124_v49 }
  0x3d   :  { %v62_v52 = vsub.f32 %v61_v48, %v41_v50  ;;  %v72_v53 = vmul.f32 16.0, %v41_v50 }
  0x3f   :  { %v73_v55 = vsub.f32 %v71_v51, %v72_v53  ;;  %v74_v56 = vmul.f32 0.9, %v62_v52 }
  0x41   :  { %v75_v57 = vmul.f32 0.00625, %v73_v55 }
  0x43   :  { %v76_v58 = vadd.f32 %v75_v57, %v74_v56 }
  0x45   :  { %v83_v59 = vsel %vm82_vm3, %v76_v58, 0.0 }
  0x46   :  { %v85_v60 = vsel %vm84_vm4, %v83_v59, 0.0 }
  0x47   :  { %86 = vadd.xlane.f32.xlu0 %v85_v60 }
  0xd4   :  { %v87_v61 = vpop.xlane.xlu0 %86 }
  0xd5   :  { %v88_v62 = vrot.slane %v87_v61, 4 }
  0xd7   :  { %v89_v63 = vadd.f32 %v88_v62, %v87_v61 }
  0xd9   :  { %v90_v0 = vrot.slane %v89_v63, 2 }
  0xdb   :  { %v91_v1 = vadd.f32 %v90_v0, %v89_v63 }
  0xdd   :  { %v92_v2 = vrot.slane %v91_v1, 1 }
  0xdf   :  { %v93_v3 = vadd.f32 %v92_v2, %v91_v1 }
  0xe1   :  { %116 = vpush %v93_v3 }
 0x112   :  { %s117_s15 = spop %116 }
 0x113   :  { %v98_v6 = vstv %s117_s15 }
 0x114   :  { %v99_v7 = vsel %vm97_vm5, %v98_v6, 0.0 }
 0x115   :  { %100 = vst [vmem:[#allocation2] sm:$0xff] %v99_v7 }
 0x116   :  { %136 = shalt.err (!%p133_p4)
}
 0x117   :  { %s137_s19 = scalar_lea.hbm %s201_s2, 128 }
 0x118   :  { %p138_p5 = scmp.ne.s32.totalorder %s201_s2, %s137_s19  ;;  %p141_p6 = scmp.lt.u32.totalorder %s137_s19, %s201_s2 }
 0x11a   :  { %p143_p7 = pnand %p141_p6, %p138_p5 }
 0x11c   :  { %146 = shalt.err (!%p143_p7)
}
 0x11d   :  { %110 = dma.vmem_to_hbm [thread:$0]  %s108_s14, 128, %s201_s2, [#allocation3]  }
 0x11e   :  { %147 = dma.done.wait [#allocation3], 128  }
 0x11f   :  { %148 = vsyncadd [#allocation3], 4294967168 }
 0x120   :  { %114 = vsyncpa [#allocation3], 1 }

</bundles_post_ra>
